<compile_context>
chip_gen: v7x
topology: tpu7x:2x2x1
jax: 0.10.0
libtpu: 0.0.40
codegen_flags: <defaults>
</compile_context>

<pallas_src>
import functools
import math

import jax
import jax.numpy as jnp
from jax.experimental import pallas as pl
from jax.experimental.pallas import tpu as pltpu


def _round_up(x, m):
    return ((x + m - 1) // m) * m


def _tpu_kind():
    try:
        return jax.devices()[0].device_kind.lower()
    except Exception:  # pragma: no cover - CPU/interpret fallback
        return ""


def _ffn_kernel(x_ref, w1_ref, b1_ref, w2_ref, b2_ref, g_ref, beta_ref,
                o_ref, *, eps, gelu_dtype):
    # Load the input tile once; derive the bf16 MXU operand and the f32
    # residual from the same value.
    x = x_ref[...]
    b1 = b1_ref[...]
    b2 = b2_ref[...]
    gamma = g_ref[...]
    beta = beta_ref[...]

    # linear_1 (bf16 x bf16 -> f32 accumulate on the MXU)
    h = jnp.dot(x.astype(jnp.bfloat16), w1_ref[...],
                preferred_element_type=jnp.float32)

    # gelu_new (HF tanh approximation).  On v6e/v7x this chain runs in bf16
    # (bf16 VALU/EUP); on v5e it stays f32.
    h = h.astype(gelu_dtype) + b1.astype(gelu_dtype)
    c = math.sqrt(2.0 / math.pi)
    h = 0.5 * h * (1.0 + jnp.tanh(c * (h + 0.044715 * (h * h * h))))

    # activation_dropout: identity at inference.
    # linear_2 (bf16 x bf16 -> f32 accumulate)
    h = jnp.dot(h.astype(jnp.bfloat16), w2_ref[...],
                preferred_element_type=jnp.float32) + b2
    # hidden_dropout: identity at inference.

    # residual + LayerNorm over d_model, all f32.
    y = x.astype(jnp.float32) + h
    mean = jnp.mean(y, axis=-1, keepdims=True)
    d = y - mean
    var = jnp.mean(d * d, axis=-1, keepdims=True)
    o_ref[...] = (d * jax.lax.rsqrt(var + eps) * gamma + beta).astype(o_ref.dtype)


def prepare_funnel_ffn_params(w1, b1, w2, b2, gamma, beta):
    """One-time parameter preparation (do this at model load, not per call).

    Returns (w1_bf16, b1_f32[1,Di], w2_bf16, b2_f32[1,D], gamma_f32[1,D],
    beta_f32[1,D]) so the per-call wrapper emits no converts / reshapes.
    """
    d_model, d_inner = w1.shape
    return (w1.astype(jnp.bfloat16),
            b1.reshape(1, d_inner).astype(jnp.float32),
            w2.astype(jnp.bfloat16),
            b2.reshape(1, d_model).astype(jnp.float32),
            gamma.reshape(1, d_model).astype(jnp.float32),
            beta.reshape(1, d_model).astype(jnp.float32))


def _as_row(v, n):
    if v.ndim == 1:
        v = v.reshape(1, n)
    if v.dtype != jnp.float32:
        v = v.astype(jnp.float32)
    return v


def funnel_positionwise_ffn(hidden, w1, b1, w2, b2, gamma, beta,
                            *, eps=1e-9, tile_rows=None):
    """hidden: [rows, d_model]; weights stored (in_features, out_features).

    Returns [rows, d_model] in hidden.dtype.  Matmuls run in bf16 on the MXU
    with f32 accumulation; residual + LayerNorm are f32.  Pass parameters from
    prepare_funnel_ffn_params() to avoid per-call weight conversion traffic.
    """
    rows, d_model = hidden.shape
    d_inner = w1.shape[1]
    out_dtype = hidden.dtype

    # Canonicalize params only if the caller did NOT pre-convert them.
    if w1.dtype != jnp.bfloat16:
        w1 = w1.astype(jnp.bfloat16)
    if w2.dtype != jnp.bfloat16:
        w2 = w2.astype(jnp.bfloat16)
    b1 = _as_row(b1, d_inner)
    b2 = _as_row(b2, d_model)
    gamma = _as_row(gamma, d_model)
    beta = _as_row(beta, d_model)

    # Generation detection (tile size, VMEM cap, gelu dtype, core count).
    kind = _tpu_kind()
    is_v7 = "v7" in kind
    bf16_vpu = ("v6" in kind) or is_v7
    num_cores = 2 if is_v7 else 1
    vmem_cap = (64 << 20) if is_v7 else (128 << 20)
    gelu_dtype = jnp.bfloat16 if bf16_vpu else jnp.float32

    # Row tile: 512 on v5e/v6e, 256 on v7x; keep >= num_cores grid steps so
    # every TensorCore gets work; keep it a sublane (8) multiple.
    if tile_rows is None:
        tile_rows = 256 if is_v7 else 512
    tile_rows = int(tile_rows)
    if num_cores > 1:
        tile_rows = min(tile_rows, _round_up(pl.cdiv(rows, num_cores), 8))
    tile_rows = max(8, min(tile_rows, _round_up(rows, 8)))
    tile_rows = _round_up(tile_rows, 8)

    grid = (pl.cdiv(rows, tile_rows),)   # partial last block handled by Pallas

    kernel = functools.partial(_ffn_kernel, eps=eps, gelu_dtype=gelu_dtype)

    const = lambda i: (0, 0)
    row_map = lambda i: (i, 0)
    # Invariant operands: single-buffered (their index_map never changes).
    single = pl.Buffered(1)

    # Explicit VMEM budget: single-buffered bf16 weights + double-buffered
    # in/out row tiles + intermediates, with headroom; cap at 80% of per-core
    # VMEM (64 MiB on v7x, 128 MiB on v5e/v6e).
    itemsize = jnp.dtype(out_dtype).itemsize
    weight_bytes = 2 * d_model * d_inner * 2             # W1 + W2, bf16
    io_bytes = 2 * 2 * tile_rows * d_model * itemsize    # in + out, 2 buffers
    interm_bytes = tile_rows * d_inner * (4 + 2)         # f32 + bf16 intermediates
    vmem_limit = int(1.5 * (weight_bytes + io_bytes + interm_bytes)) + (8 << 20)
    vmem_limit = min(max(vmem_limit, 32 << 20), int(0.8 * vmem_cap))

    out = pl.pallas_call(
        kernel,
        out_shape=jax.ShapeDtypeStruct((rows, d_model), out_dtype),
        grid_spec=pltpu.PrefetchScalarGridSpec(
            num_scalar_prefetch=0,
            grid=grid,
            in_specs=[
                pl.BlockSpec((tile_rows, d_model), row_map),                     # hidden
                pl.BlockSpec((d_model, d_inner), const, pipeline_mode=single),   # W1
                pl.BlockSpec((1, d_inner), const, pipeline_mode=single),         # b1
                pl.BlockSpec((d_inner, d_model), const, pipeline_mode=single),   # W2
                pl.BlockSpec((1, d_model), const, pipeline_mode=single),         # b2
                pl.BlockSpec((1, d_model), const, pipeline_mode=single),         # gamma
                pl.BlockSpec((1, d_model), const, pipeline_mode=single),         # beta
            ],
            out_specs=pl.BlockSpec((tile_rows, d_model), row_map),
        ),
        compiler_params=pltpu.CompilerParams(
            dimension_semantics=("parallel",),
            vmem_limit_bytes=vmem_limit),
    )(hidden, w1, b1, w2, b2, gamma, beta)
    return out


def _reference(hidden, w1, b1, w2, b2, gamma, beta, eps=1e-9):
    h = hidden @ w1 + b1
    c = math.sqrt(2.0 / math.pi)
    h = 0.5 * h * (1.0 + jnp.tanh(c * (h + 0.044715 * h ** 3)))
    h = h @ w2 + b2
    y = hidden + h
    mean = jnp.mean(y, axis=-1, keepdims=True)
    var = jnp.mean((y - mean) ** 2, axis=-1, keepdims=True)
    return (y - mean) / jnp.sqrt(var + eps) * gamma + beta


def _run_case(key, batch, seq, d_model, d_inner, tile_rows, tol):
    k_x, k_w1, k_b1, k_w2, k_b2 = jax.random.split(key, 5)
    hidden_bsd = jax.random.normal(k_x, (batch, seq, d_model), jnp.float32)
    w1 = jax.random.normal(k_w1, (d_model, d_inner), jnp.float32) * 0.02
    b1 = jax.random.normal(k_b1, (d_inner,), jnp.float32) * 0.02
    w2 = jax.random.normal(k_w2, (d_inner, d_model), jnp.float32) * 0.02
    b2 = jax.random.normal(k_b2, (d_model,), jnp.float32) * 0.02
    gamma = jnp.ones((d_model,), jnp.float32)
    beta = jnp.zeros((d_model,), jnp.float32)

    # One-time parameter prep (no per-call weight converts).
    params = prepare_funnel_ffn_params(w1, b1, w2, b2, gamma, beta)

    hidden = hidden_bsd.reshape(batch * seq, d_model)
    out = funnel_positionwise_ffn(hidden, *params, tile_rows=tile_rows)
    out = jax.block_until_ready(out)
    ref = _reference(hidden, w1, b1, w2, b2, gamma, beta)
    assert out.shape == hidden.shape
    assert jnp.allclose(out, ref, atol=tol, rtol=tol), (
        f"mismatch vs reference: max err "
        f"{float(jnp.max(jnp.abs(out - ref)))}")


if __name__ == "__main__":
    key = jax.random.PRNGKey(0)
    k0, k1 = jax.random.split(key)

    # Small config matching the module's intent: batch=2, seq=8, d_model=32,
    # d_inner=64.  (bf16 MXU / bf16-gelu on v6e+ => loose tolerance.)
    _run_case(k0, batch=2, seq=8, d_model=32, d_inner=64,
              tile_rows=None, tol=1e-2)

    # Second case exercises a multi-step grid with a PARTIAL last row-block
    # (72 rows, tile 32) and 128-lane feature dims.
    _run_case(k1, batch=2, seq=36, d_model=128, d_inner=256,
              tile_rows=32, tol=1e-2)

    print("KERNEL_OK")
</pallas_src>

<mosaic_0001>
module attributes {stable_mosaic.version = 11 : i64} {
  func.func @_ffn_kernel(%arg0: i32, %arg1: memref<16x32xf32, #tpu.memory_space<vmem>>, %arg2: memref<32x64xbf16, #tpu.memory_space<vmem>>, %arg3: memref<1x64xf32, #tpu.memory_space<vmem>>, %arg4: memref<64x32xbf16, #tpu.memory_space<vmem>>, %arg5: memref<1x32xf32, #tpu.memory_space<vmem>>, %arg6: memref<1x32xf32, #tpu.memory_space<vmem>>, %arg7: memref<1x32xf32, #tpu.memory_space<vmem>>, %arg8: memref<16x32xf32, #tpu.memory_space<vmem>>) attributes {dimension_semantics = [#tpu.dimension_semantics<parallel>], iteration_bounds = array<i64: 1>, scalar_prefetch = 0 : i64, scratch_operands = 0 : i64, tpu.core_type = #tpu.core_type<tc>, window_params = [{transform_indices = @transform_0, window_bounds = array<i64: 16, 32>}, {pipeline_mode = #tpu.pipeline_mode<synchronous>, transform_indices = @transform_1, window_bounds = array<i64: 32, 64>}, {pipeline_mode = #tpu.pipeline_mode<synchronous>, transform_indices = @transform_2, window_bounds = array<i64: 1, 64>}, {pipeline_mode = #tpu.pipeline_mode<synchronous>, transform_indices = @transform_3, window_bounds = array<i64: 64, 32>}, {pipeline_mode = #tpu.pipeline_mode<synchronous>, transform_indices = @transform_4, window_bounds = array<i64: 1, 32>}, {pipeline_mode = #tpu.pipeline_mode<synchronous>, transform_indices = @transform_5, window_bounds = array<i64: 1, 32>}, {pipeline_mode = #tpu.pipeline_mode<synchronous>, transform_indices = @transform_6, window_bounds = array<i64: 1, 32>}, {transform_indices = @transform_7, window_bounds = array<i64: 16, 32>}]} {
    %c0 = arith.constant 0 : index
    %c0_0 = arith.constant 0 : index
    %0 = vector.load %arg1[%c0, %c0_0] : memref<16x32xf32, #tpu.memory_space<vmem>>, vector<16x32xf32>
    %c0_1 = arith.constant 0 : index
    %c0_2 = arith.constant 0 : index
    %1 = vector.load %arg3[%c0_1, %c0_2] : memref<1x64xf32, #tpu.memory_space<vmem>>, vector<1x64xf32>
    %c0_3 = arith.constant 0 : index
    %c0_4 = arith.constant 0 : index
    %2 = vector.load %arg5[%c0_3, %c0_4] : memref<1x32xf32, #tpu.memory_space<vmem>>, vector<1x32xf32>
    %c0_5 = arith.constant 0 : index
    %c0_6 = arith.constant 0 : index
    %3 = vector.load %arg6[%c0_5, %c0_6] : memref<1x32xf32, #tpu.memory_space<vmem>>, vector<1x32xf32>
    %c0_7 = arith.constant 0 : index
    %c0_8 = arith.constant 0 : index
    %4 = vector.load %arg7[%c0_7, %c0_8] : memref<1x32xf32, #tpu.memory_space<vmem>>, vector<1x32xf32>
    %5 = arith.truncf %0 : vector<16x32xf32> to vector<16x32xbf16>
    %c0_9 = arith.constant 0 : index
    %c0_10 = arith.constant 0 : index
    %6 = vector.load %arg2[%c0_9, %c0_10] : memref<32x64xbf16, #tpu.memory_space<vmem>>, vector<32x64xbf16>
    %cst = arith.constant dense<0.000000e+00> : vector<16x64xf32>
    %7 = tpu.matmul %5, %6, %cst {dimension_numbers = #tpu.dot_dimension_numbers<[1], [0], [0], [1], [0, 0, 1, 1], [], []>} : vector<16x32xbf16>, vector<32x64xbf16>, vector<16x64xf32> -> vector<16x64xf32>
    %8 = vector.broadcast %1 : vector<1x64xf32> to vector<16x64xf32>
    %9 = arith.addf %7, %8 : vector<16x64xf32>
    %cst_11 = arith.constant 5.000000e-01 : f32
    %10 = vector.broadcast %cst_11 : f32 to vector<16x64xf32>
    %11 = arith.mulf %10, %9 : vector<16x64xf32>
    %12 = arith.mulf %9, %9 : vector<16x64xf32>
    %13 = arith.mulf %12, %9 : vector<16x64xf32>
    %cst_12 = arith.constant 4.471500e-02 : f32
    %14 = vector.broadcast %cst_12 : f32 to vector<16x64xf32>
    %15 = arith.mulf %14, %13 : vector<16x64xf32>
    %16 = arith.addf %9, %15 : vector<16x64xf32>
    %cst_13 = arith.constant 0.797884583 : f32
    %17 = vector.broadcast %cst_13 : f32 to vector<16x64xf32>
    %18 = arith.mulf %17, %16 : vector<16x64xf32>
    %19 = math.tanh %18 : vector<16x64xf32>
    %cst_14 = arith.constant 1.000000e+00 : f32
    %20 = vector.broadcast %cst_14 : f32 to vector<16x64xf32>
    %21 = arith.addf %20, %19 : vector<16x64xf32>
    %22 = arith.mulf %11, %21 : vector<16x64xf32>
    %23 = arith.truncf %22 : vector<16x64xf32> to vector<16x64xbf16>
    %c0_15 = arith.constant 0 : index
    %c0_16 = arith.constant 0 : index
    %24 = vector.load %arg4[%c0_15, %c0_16] : memref<64x32xbf16, #tpu.memory_space<vmem>>, vector<64x32xbf16>
    %cst_17 = arith.constant dense<0.000000e+00> : vector<16x32xf32>
    %25 = tpu.matmul %23, %24, %cst_17 {dimension_numbers = #tpu.dot_dimension_numbers<[1], [0], [0], [1], [0, 0, 1, 1], [], []>} : vector<16x64xbf16>, vector<64x32xbf16>, vector<16x32xf32> -> vector<16x32xf32>
    %26 = vector.broadcast %2 : vector<1x32xf32> to vector<16x32xf32>
    %27 = arith.addf %25, %26 : vector<16x32xf32>
    %28 = arith.addf %0, %27 : vector<16x32xf32>
    %cst_18 = arith.constant dense<0.000000e+00> : vector<16xf32>
    %29 = vector.multi_reduction <add>, %28, %cst_18 [1] : vector<16x32xf32> to vector<16xf32>
    %30 = vector.shape_cast %29 : vector<16xf32> to vector<16x1xf32>
    %cst_19 = arith.constant 3.200000e+01 : f32
    %31 = vector.broadcast %cst_19 : f32 to vector<16x1xf32>
    %32 = arith.divf %30, %31 : vector<16x1xf32>
    %33 = vector.broadcast %32 : vector<16x1xf32> to vector<16x32xf32>
    %34 = arith.subf %28, %33 : vector<16x32xf32>
    %35 = arith.mulf %34, %34 : vector<16x32xf32>
    %cst_20 = arith.constant dense<0.000000e+00> : vector<16xf32>
    %36 = vector.multi_reduction <add>, %35, %cst_20 [1] : vector<16x32xf32> to vector<16xf32>
    %37 = vector.shape_cast %36 : vector<16xf32> to vector<16x1xf32>
    %cst_21 = arith.constant 3.200000e+01 : f32
    %38 = vector.broadcast %cst_21 : f32 to vector<16x1xf32>
    %39 = arith.divf %37, %38 : vector<16x1xf32>
    %cst_22 = arith.constant 9.99999971E-10 : f32
    %40 = vector.broadcast %cst_22 : f32 to vector<16x1xf32>
    %41 = arith.addf %39, %40 : vector<16x1xf32>
    %42 = math.rsqrt %41 : vector<16x1xf32>
    %43 = vector.broadcast %42 : vector<16x1xf32> to vector<16x32xf32>
    %44 = arith.mulf %34, %43 : vector<16x32xf32>
    %45 = vector.broadcast %3 : vector<1x32xf32> to vector<16x32xf32>
    %46 = arith.mulf %44, %45 : vector<16x32xf32>
    %47 = vector.broadcast %4 : vector<1x32xf32> to vector<16x32xf32>
    %48 = arith.addf %46, %47 : vector<16x32xf32>
    %c0_23 = arith.constant 0 : index
    %c0_24 = arith.constant 0 : index
    %49 = vector.load %arg8[%c0_23, %c0_24] : memref<16x32xf32, #tpu.memory_space<vmem>>, vector<16x32xf32>
    tpu.vector_store %arg8[%c0_23, %c0_24], %48 {strides = array<i32>} : memref<16x32xf32, #tpu.memory_space<vmem>>, vector<16x32xf32>,
    return
  }
  func.func @transform_0(%arg0: i32) -> (i32, i32) {
    %c0_i32 = arith.constant 0 : i32
    %c0_i32_0 = arith.constant 0 : i32
    return %arg0, %c0_i32 : i32, i32
  }
  func.func @transform_1(%arg0: i32) -> (i32, i32) {
    %c0_i32 = arith.constant 0 : i32
    %c0_i32_0 = arith.constant 0 : i32
    %c0_i32_1 = arith.constant 0 : i32
    return %c0_i32, %c0_i32_0 : i32, i32
  }
  func.func @transform_2(%arg0: i32) -> (i32, i32) {
    %c0_i32 = arith.constant 0 : i32
    %c0_i32_0 = arith.constant 0 : i32
    %c0_i32_1 = arith.constant 0 : i32
    return %c0_i32, %c0_i32_0 : i32, i32
  }
  func.func @transform_3(%arg0: i32) -> (i32, i32) {
    %c0_i32 = arith.constant 0 : i32
    %c0_i32_0 = arith.constant 0 : i32
    %c0_i32_1 = arith.constant 0 : i32
    return %c0_i32, %c0_i32_0 : i32, i32
  }
  func.func @transform_4(%arg0: i32) -> (i32, i32) {
    %c0_i32 = arith.constant 0 : i32
    %c0_i32_0 = arith.constant 0 : i32
    %c0_i32_1 = arith.constant 0 : i32
    return %c0_i32, %c0_i32_0 : i32, i32
  }
  func.func @transform_5(%arg0: i32) -> (i32, i32) {
    %c0_i32 = arith.constant 0 : i32
    %c0_i32_0 = arith.constant 0 : i32
    %c0_i32_1 = arith.constant 0 : i32
    return %c0_i32, %c0_i32_0 : i32, i32
  }
  func.func @transform_6(%arg0: i32) -> (i32, i32) {
    %c0_i32 = arith.constant 0 : i32
    %c0_i32_0 = arith.constant 0 : i32
    %c0_i32_1 = arith.constant 0 : i32
    return %c0_i32, %c0_i32_0 : i32, i32
  }
  func.func @transform_7(%arg0: i32) -> (i32, i32) {
    %c0_i32 = arith.constant 0 : i32
    %c0_i32_0 = arith.constant 0 : i32
    return %arg0, %c0_i32 : i32, i32
  }
}

</mosaic_0001>

<bundles_post_ra>
// kernel: tpu_custom_call.1
= control target key start
LH: loop header
LB: loop body
LE: loop exit
PB: predicated region body
PF: predicated region fallthrough
CT: control target
= control target key end

     0   :  { %v350_v1 = vmov 0.0   ;;  %vm351_vm0 = vmmov 0   ;;  %s450_s0 = inlined_call_operand.vmem [shape: f32[16,32], index: 0, kind: input, shape index: {}]   ;;  %s451_s1 = inlined_call_operand.vmem [shape: bf16[32,64], index: 1, kind: input, shape index: {}]   ;;  %s452_s2 = inlined_call_operand.vmem [shape: f32[1,64], index: 2, kind: input, shape index: {}]   ;;  %s453_s3 = inlined_call_operand.vmem [shape: bf16[64,32], index: 3, kind: input, shape index: {}]   ;;  %s454_s4 = inlined_call_operand.vmem [shape: f32[1,32], index: 4, kind: input, shape index: {}]   ;;  %s455_s5 = inlined_call_operand.vmem [shape: f32[1,32], index: 5, kind: input, shape index: {}]   ;;  %s456_s6 = inlined_call_operand.vmem [shape: f32[1,32], index: 6, kind: input, shape index: {}]   ;;  %s457_s7 = inlined_call_operand.hbm [shape: f32[16,32], index: 7, kind: output, shape index: {}]  }
   0x1   :  { %v312_v0 = vld [vmem:[%s451_s1] sm:$0xff]   ;;  %287 = vmatprep.subr.bf16.mxu0 %v350_v1  ;;  %295 = vmatprep.subr.bf16.mxu1 %v350_v1  ;;  %v313_v2 = vld [vmem:[%s451_s1 + $0x8] sm:$0xff]  }
   0x2   :  { %288 = vmatpush3.bf16.msra.mxu0 %v312_v0  ;;  %291 = vmatprep.mubr.msk.bf16.mxu0 %vm351_vm0, %v350_v1  ;;  %v28_v3 = vld [vmem:[%s450_s0] sm:$0xff]  ;;  %v29_v4 = vld [vmem:[%s450_s0 + $0x8] sm:$0xff] }
   0x3   :  { %289 = vmatprep.subr.bf16.mxu0 %v350_v1  ;;  %303 = vmatprep.mubr.msk.bf16.mxu1 %vm351_vm0, %v350_v1  ;;  %v34_v5 = vpack.c.bf16 %v29_v4, %v28_v3 }
   0x4   :  { %12 = vsyncpa [#allocation3], 0  ;;  %vm57_vm1 = vcmask 261120   ;;  %v314_v6 = vld [vmem:[%s453_s3] sm:$0xff]   ;;  %v315_v7 = vld [vmem:[%s453_s3 + $0x8] sm:$0xff]   ;;  %vm159_vm2 = vcmask 523264  }
   0x5   :  { %296 = vmatpush3.bf16.msra.mxu1 %v314_v6  ;;  %v316_v8 = vld [vmem:[%s453_s3 + $0x10] sm:$0xff]   ;;  %v317_v9 = vld [vmem:[%s453_s3 + $0x18] sm:$0xff]   ;;  %v267_v10 = vld [vmem:[%s452_s2] ss:$0 sm:$0xff]  ;;  %s352_s20 = smov [#allocation2]  }
   0x6   :  { %290 = vmatpush3.bf16.msra.mxu0 %v313_v2  ;;  %297 = vmatprep.subr.bf16.mxu1 %v350_v1  ;;  %v271_v36 = vld [vmem:[%s454_s4] ss:$0 sm:$0xff]  ;;  %s256_s21 = sshll.u32 %s352_s20, 4  ;;  %s257_s21 = int_to_ptr.vmem [resolvable:$true] %s256_s21 }
   0x7   :  { %v277_v0 = vld [vmem:[%s455_s5] ss:$0 sm:$0xff]  ;;  %s326_s22 = scalar_lea.vmem %s257_s21, 256  ;;  %p331_p1 = scmp.lt.s32.totalorder %s257_s21, %s257_s21 }
   0x8   :  { %v278_v2 = vld [vmem:[%s456_s6] ss:$0 sm:$0xff]  ;;  %p327_p0 = scmp.ne.s32.totalorder %s257_s21, %s326_s22  ;;  %p332_p2 = scmp.lt.s32.totalorder %s326_s22, %s326_s22 }
   0x9   :  { %292 = vmatmul.mubr.msk.bf16.vlgmr.msra.gmra.mrb[0].mxu0 %vm57_vm1, %v34_v5  ;;  %298 = vmatpush3.bf16.msra.mxu1 %v315_v7 }
   0xa   :  { %299 = vmatprep.subr.bf16.mxu1 %v350_v1  ;;  %p333_p3 = por %p332_p2, %p331_p1 }
   0xc   :  { %p334_p4 = pnand %p333_p3, %p327_p0 }
   0xd   :  { %300 = vmatpush3.bf16.msra.mxu1 %v316_v8 }
   0xe   :  { %301 = vmatprep.subr.bf16.mxu1 %v350_v1 }
  0x11   :  { %302 = vmatpush3.bf16.msra.mxu1 %v317_v9 }
  0xdc   :  { %v95_v11 = vpop.f32.mrb[0].mxu0 }
  0xdd   :  { %v96_v12 = vadd.f32 %v267_v10, %v95_v11  ;;  %v293_v13 = vpop.f32.mrb[1].mxu0 }
  0xde   :  { %v98_v14 = vpop.f32.mrb[2].mxu0 }
  0xdf   :  { %v104_v15 = vmul.f32 %v96_v12, %v96_v12  ;;  %v99_v16 = vadd.f32 %v267_v10, %v98_v14  ;;  %v294_v17 = vpop.f32.mrb[3].mxu0  ;;  %v102_v30 = vmul.f32 0.5, %v96_v12 }
  0xe1   :  { %v106_v18 = vmul.f32 %v104_v15, %v96_v12  ;;  %v105_v19 = vmul.f32 %v99_v16, %v99_v16  ;;  %v103_v31 = vmul.f32 0.5, %v99_v16 }
  0xe3   :  { %v108_v20 = vmul.f32 0.044715, %v106_v18  ;;  %v107_v21 = vmul.f32 %v105_v19, %v99_v16 }
  0xe5   :  { %v110_v22 = vadd.f32 %v108_v20, %v96_v12  ;;  %v109_v23 = vmul.f32 0.044715, %v107_v21 }
  0xe7   :  { %v112_v24 = vmul.f32 0.7978846, %v110_v22  ;;  %v111_v25 = vadd.f32 %v109_v23, %v99_v16 }
  0xe9   :  { %318 = vtanh.f32 %v112_v24  ;;  %v113_v26 = vmul.f32 0.7978846, %v111_v25 }
  0xeb   :  { %320 = vtanh.f32 %v113_v26 }
  0xf3   :  { %v319_v27 = vpop.eup %318 }
  0xf4   :  { %v116_v28 = vadd.f32 1.0, %v319_v27 }
  0xf5   :  { %v321_v29 = vpop.eup %320 }
  0xf6   :  { %v117_v32 = vadd.f32 1.0, %v321_v29  ;;  %v118_v33 = vmul.f32 %v116_v28, %v102_v30 }
  0xf8   :  { %v119_v34 = vmul.f32 %v117_v32, %v103_v31 }
  0xfa   :  { %v120_v35 = vpack.c.bf16 %v119_v34, %v118_v33 }
  0xfc   :  { %304 = vmatmul.mubr.msk.bf16.vlgmr.msra.gmra.mrb[0].mxu1 %vm159_vm2, %v120_v35 }
 0x1cf   :  { %v197_v37 = vpop.f32.mrb[0].mxu1 }
 0x1d0   :  { %v198_v38 = vadd.f32 %v271_v36, %v197_v37  ;;  %v305_v39 = vpop.f32.mrb[1].mxu1 }
 0x1d1   :  { %v200_v40 = vpop.f32.mrb[2].mxu1 }
 0x1d2   :  { %v201_v41 = vadd.f32 %v271_v36, %v200_v40  ;;  %v306_v42 = vpop.f32.mrb[3].mxu1  ;;  %v204_v43 = vadd.f32 %v198_v38, %v28_v3 }
 0x1d4   :  { %v206_v44 = vsel %vm57_vm1, %v204_v43, 0.0  ;;  %v205_v45 = vadd.f32 %v201_v41, %v29_v4 }
 0x1d5   :  { %207 = vadd.xlane.f32.xlu0 %v206_v44 }
 0x1d6   :  { %v209_v46 = vsel %vm57_vm1, %v205_v45, 0.0 }
 0x1d9   :  { %210 = vadd.xlane.f32.xlu0 %v209_v46 }
 0x262   :  { %v208_v47 = vpop.xlane.xlu0 %207 }
 0x263   :  { %v213_v48 = vmul.f32 0.03125, %v208_v47 }
 0x265   :  { %v215_v49 = vsub.f32 %v204_v43, %v213_v48 }
 0x266   :  { %v211_v50 = vpop.xlane.xlu0 %210 }
 0x267   :  { %v214_v51 = vmul.f32 0.03125, %v211_v50  ;;  %v217_v52 = vmul.f32 %v215_v49, %v215_v49 }
 0x269   :  { %v216_v53 = vsub.f32 %v205_v45, %v214_v51  ;;  %v219_v54 = vsel %vm57_vm1, %v217_v52, 0.0 }
 0x26a   :  { %220 = vadd.xlane.f32.xlu1 %v219_v54 }
 0x26b   :  { %v218_v55 = vmul.f32 %v216_v53, %v216_v53 }
 0x26d   :  { %v222_v56 = vsel %vm57_vm1, %v218_v55, 0.0 }
 0x26e   :  { %223 = vadd.xlane.f32.xlu1 %v222_v56 }
 0x2f7   :  { %v221_v57 = vpop.xlane.xlu1 %220 }
 0x2f8   :  { %v225_v58 = vmul.f32 0.03125, %v221_v57 }
 0x2fa   :  { %v227_v59 = vadd.f32 1e-09, %v225_v58 }
 0x2fb   :  { %v224_v60 = vpop.xlane.xlu1 %223 }
 0x2fc   :  { %322 = vrsqrt.f32 %v227_v59  ;;  %v226_v61 = vmul.f32 0.03125, %v224_v60 }
 0x2fe   :  { %v228_v62 = vadd.f32 1e-09, %v226_v61 }
 0x300   :  { %324 = vrsqrt.f32 %v228_v62 }
 0x306   :  { %v323_v63 = vpop.eup %322 }
 0x307   :  { %v231_v1 = vmul.f32 %v323_v63, %v215_v49 }
 0x309   :  { %v239_v3 = vmul.f32 %v277_v0, %v231_v1 }
 0x30a   :  { %v325_v4 = vpop.eup %324 }
 0x30b   :  { %v232_v5 = vmul.f32 %v325_v4, %v216_v53  ;;  %v247_v6 = vadd.f32 %v278_v2, %v239_v3 }
 0x30d   :  { %v240_v7 = vmul.f32 %v277_v0, %v232_v5  ;;  %249 = vst.msk [vmem:[#allocation2] sm:$0xff] %vm57_vm1, %v247_v6 }
 0x30f   :  { %v248_v8 = vadd.f32 %v278_v2, %v240_v7 }
 0x311   :  { %250 = vst.msk [vmem:[#allocation2 + $0x8] sm:$0xff] %vm57_vm1, %v248_v8 }
 0x312   :  { %337 = shalt.err (!%p334_p4)
}
 0x313   :  { %s338_s23 = scalar_lea.hbm %s457_s7, 256 }
 0x314   :  { %p339_p5 = scmp.ne.s32.totalorder %s457_s7, %s338_s23  ;;  %p342_p6 = scmp.lt.u32.totalorder %s338_s23, %s457_s7 }
 0x316   :  { %p344_p7 = pnand %p342_p6, %p339_p5 }
 0x318   :  { %347 = shalt.err (!%p344_p7)
}
 0x319   :  { %s353_s28 = smov 128   ;;  %s354_s29 = smov 8  }
 0x31a   :  { %262 = dma.vmem_to_hbm [thread:$0]  %s257_s21, 256, %s457_s7, [#allocation3], %s353_s28, %s353_s28, %s354_s29  }
 0x31b   :  { %348 = dma.done.wait [#allocation3], 256  }
 0x31c   :  { %349 = vsyncadd [#allocation3], 4294967040 }
 0x31d   :  { %266 = vsyncpa [#allocation3], 1 }

</bundles_post_ra>
